<compile_context>
chip_gen: v5e
topology: v5e:2x2
jax: 0.10.0
libtpu: 0.0.40
codegen_flags: <defaults>
</compile_context>

<pallas_src>
import jax
import jax.numpy as jnp
from jax.experimental import pallas as pl
from jax.experimental.pallas import tpu as pltpu

DROPOUT_P = 0.005


def _softplus(x):
    # Numerically stable softplus = log(1 + exp(x)); matches torch.nn.Softplus (beta=1).
    return jnp.logaddexp(x, 0.0)


def _mlp_kernel(x_ref, m1_ref, m2_ref,
                w1_ref, b1_ref, w2_ref, b2_ref, w3_ref, b3_ref,
                out_ref):
    # Feature-major layout: columns = samples (lane dim), rows = features (sublane dim).
    x = x_ref[...]                                                                   # (IN,  TM)

    h1 = jnp.dot(w1_ref[...], x, preferred_element_type=jnp.float32) + b1_ref[...]  # (H1, TM)
    h1 = _softplus(h1) * m1_ref[...]            # softplus + MC dropout (mask pre-scaled by 1/(1-p))

    h2 = jnp.dot(w2_ref[...], h1, preferred_element_type=jnp.float32) + b2_ref[...] # (H2, TM)
    h2 = _softplus(h2) * m2_ref[...]

    h3 = jnp.dot(w3_ref[...], h2, preferred_element_type=jnp.float32) + b3_ref[...] # (2,  TM)

    # Row 0 -> loc, row 1 -> softplus(raw) + 1e-6.  Select with a sublane iota mask instead of
    # width-1 slices + concatenate; the (2, TILE_M) output slab is lane-dense.
    row = jax.lax.broadcasted_iota(jnp.int32, h3.shape, 0)
    out_ref[...] = jnp.where(row == 0, h3, _softplus(h3) + 1e-6)


def _forward_rows(x_rows, params, key, *, tile_m=128):
    """One stochastic pass of the MLP over a (M, input_size) row batch -> (loc, scale), each (M,)."""
    w1, b1, w2, b2, w3, b3 = params            # PyTorch orientation: w = (out, in), b = (out,)
    M, in_dim = x_rows.shape
    h1, h2 = w1.shape[0], w2.shape[0]

    m_pad = pl.cdiv(M, tile_m) * tile_m
    grid = (m_pad // tile_m,)

    # Transpose + zero-pad the sample axis up to a multiple of the lane tile.
    x_t = jnp.zeros((in_dim, m_pad), jnp.float32).at[:, :M].set(x_rows.T.astype(jnp.float32))

    # Pre-scaled MC-dropout masks: 0 or 1/(1-p).
    k1, k2 = jax.random.split(key)
    inv_keep = 1.0 / (1.0 - DROPOUT_P)
    m1 = jax.random.bernoulli(k1, 1.0 - DROPOUT_P, (h1, m_pad)).astype(jnp.float32) * inv_keep
    m2 = jax.random.bernoulli(k2, 1.0 - DROPOUT_P, (h2, m_pad)).astype(jnp.float32) * inv_keep

    def col_tiled(rows):
        return pl.BlockSpec((rows, tile_m), lambda i: (0, i))

    def resident(shape):
        return pl.BlockSpec(shape, lambda i: (0, 0))

    out = pl.pallas_call(
        _mlp_kernel,
        out_shape=jax.ShapeDtypeStruct((2, m_pad), jnp.float32),
        grid=grid,
        in_specs=[
            col_tiled(in_dim),                 # x   (IN, M)
            col_tiled(h1),                     # dropout mask 1 (H1, M)
            col_tiled(h2),                     # dropout mask 2 (H2, M)
            resident((h1, in_dim)),            # W1
            resident((h1, 1)),                 # b1
            resident((h2, h1)),                # W2
            resident((h2, 1)),                 # b2
            resident((2, h2)),                 # W3
            resident((2, 1)),                  # b3
        ],
        out_specs=pl.BlockSpec((2, tile_m), lambda i: (0, i)),
        compiler_params=pltpu.CompilerParams(dimension_semantics=("parallel",)),
    )(
        x_t, m1, m2,
        w1.astype(jnp.float32), b1.reshape(h1, 1).astype(jnp.float32),
        w2.astype(jnp.float32), b2.reshape(h2, 1).astype(jnp.float32),
        w3.astype(jnp.float32), b3.reshape(2, 1).astype(jnp.float32),
    )

    return out[0, :M], out[1, :M]


def prob_mc_dropout_dnn_forward(x, params, key, *, tile_m=128):
    """Single stochastic pass == ProbMCdropoutDNN.forward.  Returns (loc, scale), each (B,)."""
    return _forward_rows(x, params, key, tile_m=tile_m)


def prob_mc_dropout_dnn_mc_forward(x, params, key, num_samples, *, tile_m=128):
    """num_samples independent MC-dropout passes fused into ONE kernel call (samples stacked along
    the lane/sample axis).  Returns (loc, scale), each (num_samples, B)."""
    B = x.shape[0]
    x_rep = jnp.tile(x, (num_samples, 1))                       # (S*B, input_size)
    loc, scale = _forward_rows(x_rep, params, key, tile_m=tile_m)
    return loc.reshape(num_samples, B), scale.reshape(num_samples, B)


def init_params(key, input_size, hidden_size_1=50, hidden_size_2=20):
    """nn.Linear default init: U(-1/sqrt(fan_in), 1/sqrt(fan_in)); PyTorch (out, in) orientation."""
    def linear(k, fan_in, fan_out):
        kw, kb = jax.random.split(k)
        bound = 1.0 / jnp.sqrt(float(fan_in))
        w = jax.random.uniform(kw, (fan_out, fan_in), jnp.float32, -bound, bound)
        b = jax.random.uniform(kb, (fan_out,), jnp.float32, -bound, bound)
        return w, b

    k1, k2, k3 = jax.random.split(key, 3)
    w1, b1 = linear(k1, input_size, hidden_size_1)
    w2, b2 = linear(k2, hidden_size_1, hidden_size_2)
    w3, b3 = linear(k3, hidden_size_2, 2)
    return (w1, b1, w2, b2, w3, b3)


if __name__ == "__main__":
    key = jax.random.PRNGKey(0)
    k_param, k_x, k_drop1, k_drop2 = jax.random.split(key, 4)

    B, INPUT_SIZE, MC_SAMPLES = 8, 16, 32
    params = init_params(k_param, INPUT_SIZE)
    x = jax.random.normal(k_x, (B, INPUT_SIZE), dtype=jnp.float32)

    # Single stochastic pass (== module.forward): Normal(loc, scale) parameters, shape (B,).
    loc, scale = prob_mc_dropout_dnn_forward(x, params, k_drop1)

    # 32 MC-dropout passes fused into one gridded call: M = 256 sample-columns, 2 tiles of 128.
    loc_mc, scale_mc = prob_mc_dropout_dnn_mc_forward(x, params, k_drop2, MC_SAMPLES)

    jax.block_until_ready((loc, scale, loc_mc, scale_mc))

    assert loc.shape == (B,) and scale.shape == (B,)
    assert loc_mc.shape == (MC_SAMPLES, B) and scale_mc.shape == (MC_SAMPLES, B)
    assert bool(jnp.all(scale > 0.0)) and bool(jnp.all(scale_mc > 0.0))
    assert bool(jnp.all(jnp.isfinite(loc))) and bool(jnp.all(jnp.isfinite(loc_mc)))
    print("KERNEL_OK")
</pallas_src>

<mosaic_0001>
module attributes {stable_mosaic.version = 11 : i64} {
  func.func @_mlp_kernel(%arg0: i32, %arg1: memref<16x128xf32, #tpu.memory_space<vmem>>, %arg2: memref<50x128xf32, #tpu.memory_space<vmem>>, %arg3: memref<20x128xf32, #tpu.memory_space<vmem>>, %arg4: memref<50x16xf32, #tpu.memory_space<vmem>>, %arg5: memref<50x1xf32, #tpu.memory_space<vmem>>, %arg6: memref<20x50xf32, #tpu.memory_space<vmem>>, %arg7: memref<20x1xf32, #tpu.memory_space<vmem>>, %arg8: memref<2x20xf32, #tpu.memory_space<vmem>>, %arg9: memref<2x1xf32, #tpu.memory_space<vmem>>, %arg10: memref<2x128xf32, #tpu.memory_space<vmem>>) attributes {dimension_semantics = [#tpu.dimension_semantics<parallel>], iteration_bounds = array<i64: 1>, scalar_prefetch = 0 : i64, scratch_operands = 0 : i64, tpu.core_type = #tpu.core_type<tc>, window_params = [{transform_indices = @transform_0, window_bounds = array<i64: 16, 128>}, {transform_indices = @transform_1, window_bounds = array<i64: 50, 128>}, {transform_indices = @transform_2, window_bounds = array<i64: 20, 128>}, {pipeline_mode = #tpu.pipeline_mode<synchronous>, transform_indices = @transform_3, window_bounds = array<i64: 50, 16>}, {pipeline_mode = #tpu.pipeline_mode<synchronous>, transform_indices = @transform_4, window_bounds = array<i64: 50, 1>}, {pipeline_mode = #tpu.pipeline_mode<synchronous>, transform_indices = @transform_5, window_bounds = array<i64: 20, 50>}, {pipeline_mode = #tpu.pipeline_mode<synchronous>, transform_indices = @transform_6, window_bounds = array<i64: 20, 1>}, {pipeline_mode = #tpu.pipeline_mode<synchronous>, transform_indices = @transform_7, window_bounds = array<i64: 2, 20>}, {pipeline_mode = #tpu.pipeline_mode<synchronous>, transform_indices = @transform_8, window_bounds = array<i64: 2, 1>}, {transform_indices = @transform_9, window_bounds = array<i64: 2, 128>}]} {
    %c0 = arith.constant 0 : index
    %c0_0 = arith.constant 0 : index
    %0 = vector.load %arg1[%c0, %c0_0] : memref<16x128xf32, #tpu.memory_space<vmem>>, vector<16x128xf32>
    %c0_1 = arith.constant 0 : index
    %c0_2 = arith.constant 0 : index
    %1 = vector.load %arg4[%c0_1, %c0_2] : memref<50x16xf32, #tpu.memory_space<vmem>>, vector<50x16xf32>
    %cst = arith.constant dense<0.000000e+00> : vector<50x128xf32>
    %2 = tpu.matmul %1, %0, %cst {dimension_numbers = #tpu.dot_dimension_numbers<[1], [0], [0], [1], [0, 0, 1, 1], [], []>} : vector<50x16xf32>, vector<16x128xf32>, vector<50x128xf32> -> vector<50x128xf32>
    %c0_3 = arith.constant 0 : index
    %c0_4 = arith.constant 0 : index
    %3 = vector.load %arg5[%c0_3, %c0_4] : memref<50x1xf32, #tpu.memory_space<vmem>>, vector<50x1xf32>
    %4 = vector.broadcast %3 : vector<50x1xf32> to vector<50x128xf32>
    %5 = arith.addf %2, %4 : vector<50x128xf32>
    %cst_5 = arith.constant 0.000000e+00 : f32
    %6 = vector.broadcast %cst_5 : f32 to vector<50x128xf32>
    %7 = arith.maximumf %5, %6 : vector<50x128xf32>
    %8 = vector.broadcast %cst_5 : f32 to vector<50x128xf32>
    %9 = arith.subf %5, %8 : vector<50x128xf32>
    %10 = arith.cmpf one, %9, %9 : vector<50x128xf32>
    %11 = vector.broadcast %cst_5 : f32 to vector<50x128xf32>
    %12 = arith.addf %5, %11 : vector<50x128xf32>
    %13 = math.absf %9 : vector<50x128xf32>
    %cst_6 = arith.constant 0.000000e+00 : f32
    %14 = vector.broadcast %cst_6 : f32 to vector<50x128xf32>
    %15 = arith.subf %14, %13 : vector<50x128xf32>
    %16 = math.exp %15 : vector<50x128xf32>
    %17 = math.log1p %16 : vector<50x128xf32>
    %18 = arith.addf %7, %17 : vector<50x128xf32>
    %19 = arith.select %10, %12, %18 : vector<50x128xi1>, vector<50x128xf32>
    %c0_7 = arith.constant 0 : index
    %c0_8 = arith.constant 0 : index
    %20 = vector.load %arg2[%c0_7, %c0_8] : memref<50x128xf32, #tpu.memory_space<vmem>>, vector<50x128xf32>
    %21 = arith.mulf %19, %20 : vector<50x128xf32>
    %c0_9 = arith.constant 0 : index
    %c0_10 = arith.constant 0 : index
    %22 = vector.load %arg6[%c0_9, %c0_10] : memref<20x50xf32, #tpu.memory_space<vmem>>, vector<20x50xf32>
    %cst_11 = arith.constant dense<0.000000e+00> : vector<20x128xf32>
    %23 = tpu.matmul %22, %21, %cst_11 {dimension_numbers = #tpu.dot_dimension_numbers<[1], [0], [0], [1], [0, 0, 1, 1], [], []>} : vector<20x50xf32>, vector<50x128xf32>, vector<20x128xf32> -> vector<20x128xf32>
    %c0_12 = arith.constant 0 : index
    %c0_13 = arith.constant 0 : index
    %24 = vector.load %arg7[%c0_12, %c0_13] : memref<20x1xf32, #tpu.memory_space<vmem>>, vector<20x1xf32>
    %25 = vector.broadcast %24 : vector<20x1xf32> to vector<20x128xf32>
    %26 = arith.addf %23, %25 : vector<20x128xf32>
    %cst_14 = arith.constant 0.000000e+00 : f32
    %27 = vector.broadcast %cst_14 : f32 to vector<20x128xf32>
    %28 = arith.maximumf %26, %27 : vector<20x128xf32>
    %29 = vector.broadcast %cst_14 : f32 to vector<20x128xf32>
    %30 = arith.subf %26, %29 : vector<20x128xf32>
    %31 = arith.cmpf one, %30, %30 : vector<20x128xf32>
    %32 = vector.broadcast %cst_14 : f32 to vector<20x128xf32>
    %33 = arith.addf %26, %32 : vector<20x128xf32>
    %34 = math.absf %30 : vector<20x128xf32>
    %cst_15 = arith.constant 0.000000e+00 : f32
    %35 = vector.broadcast %cst_15 : f32 to vector<20x128xf32>
    %36 = arith.subf %35, %34 : vector<20x128xf32>
    %37 = math.exp %36 : vector<20x128xf32>
    %38 = math.log1p %37 : vector<20x128xf32>
    %39 = arith.addf %28, %38 : vector<20x128xf32>
    %40 = arith.select %31, %33, %39 : vector<20x128xi1>, vector<20x128xf32>
    %c0_16 = arith.constant 0 : index
    %c0_17 = arith.constant 0 : index
    %41 = vector.load %arg3[%c0_16, %c0_17] : memref<20x128xf32, #tpu.memory_space<vmem>>, vector<20x128xf32>
    %42 = arith.mulf %40, %41 : vector<20x128xf32>
    %c0_18 = arith.constant 0 : index
    %c0_19 = arith.constant 0 : index
    %43 = vector.load %arg8[%c0_18, %c0_19] : memref<2x20xf32, #tpu.memory_space<vmem>>, vector<2x20xf32>
    %cst_20 = arith.constant dense<0.000000e+00> : vector<2x128xf32>
    %44 = tpu.matmul %43, %42, %cst_20 {dimension_numbers = #tpu.dot_dimension_numbers<[1], [0], [0], [1], [0, 0, 1, 1], [], []>} : vector<2x20xf32>, vector<20x128xf32>, vector<2x128xf32> -> vector<2x128xf32>
    %c0_21 = arith.constant 0 : index
    %c0_22 = arith.constant 0 : index
    %45 = vector.load %arg9[%c0_21, %c0_22] : memref<2x1xf32, #tpu.memory_space<vmem>>, vector<2x1xf32>
    %46 = vector.broadcast %45 : vector<2x1xf32> to vector<2x128xf32>
    %47 = arith.addf %44, %46 : vector<2x128xf32>
    %48 = tpu.iota {dimensions = array<i32: 0>} : vector<2x128xi32>
    %c0_i32 = arith.constant 0 : i32
    %49 = vector.broadcast %c0_i32 : i32 to vector<2x128xi32>
    %50 = arith.cmpi eq, %48, %49 : vector<2x128xi32>
    %cst_23 = arith.constant 0.000000e+00 : f32
    %51 = vector.broadcast %cst_23 : f32 to vector<2x128xf32>
    %52 = arith.maximumf %47, %51 : vector<2x128xf32>
    %53 = vector.broadcast %cst_23 : f32 to vector<2x128xf32>
    %54 = arith.subf %47, %53 : vector<2x128xf32>
    %55 = arith.cmpf one, %54, %54 : vector<2x128xf32>
    %56 = vector.broadcast %cst_23 : f32 to vector<2x128xf32>
    %57 = arith.addf %47, %56 : vector<2x128xf32>
    %58 = math.absf %54 : vector<2x128xf32>
    %cst_24 = arith.constant 0.000000e+00 : f32
    %59 = vector.broadcast %cst_24 : f32 to vector<2x128xf32>
    %60 = arith.subf %59, %58 : vector<2x128xf32>
    %61 = math.exp %60 : vector<2x128xf32>
    %62 = math.log1p %61 : vector<2x128xf32>
    %63 = arith.addf %52, %62 : vector<2x128xf32>
    %64 = arith.select %55, %57, %63 : vector<2x128xi1>, vector<2x128xf32>
    %cst_25 = arith.constant 9.99999997E-7 : f32
    %65 = vector.broadcast %cst_25 : f32 to vector<2x128xf32>
    %66 = arith.addf %64, %65 : vector<2x128xf32>
    %67 = arith.select %50, %47, %66 : vector<2x128xi1>, vector<2x128xf32>
    %c0_26 = arith.constant 0 : index
    %c0_27 = arith.constant 0 : index
    %68 = vector.load %arg10[%c0_26, %c0_27] : memref<2x128xf32, #tpu.memory_space<vmem>>, vector<2x128xf32>
    tpu.vector_store %arg10[%c0_26, %c0_27], %67 {strides = array<i32>} : memref<2x128xf32, #tpu.memory_space<vmem>>, vector<2x128xf32>,
    return
  }
  func.func @transform_0(%arg0: i32) -> (i32, i32) {
    %c0_i32 = arith.constant 0 : i32
    %c0_i32_0 = arith.constant 0 : i32
    return %c0_i32, %arg0 : i32, i32
  }
  func.func @transform_1(%arg0: i32) -> (i32, i32) {
    %c0_i32 = arith.constant 0 : i32
    %c0_i32_0 = arith.constant 0 : i32
    return %c0_i32, %arg0 : i32, i32
  }
  func.func @transform_2(%arg0: i32) -> (i32, i32) {
    %c0_i32 = arith.constant 0 : i32
    %c0_i32_0 = arith.constant 0 : i32
    return %c0_i32, %arg0 : i32, i32
  }
  func.func @transform_3(%arg0: i32) -> (i32, i32) {
    %c0_i32 = arith.constant 0 : i32
    %c0_i32_0 = arith.constant 0 : i32
    %c0_i32_1 = arith.constant 0 : i32
    return %c0_i32, %c0_i32_0 : i32, i32
  }
  func.func @transform_4(%arg0: i32) -> (i32, i32) {
    %c0_i32 = arith.constant 0 : i32
    %c0_i32_0 = arith.constant 0 : i32
    %c0_i32_1 = arith.constant 0 : i32
    return %c0_i32, %c0_i32_0 : i32, i32
  }
  func.func @transform_5(%arg0: i32) -> (i32, i32) {
    %c0_i32 = arith.constant 0 : i32
    %c0_i32_0 = arith.constant 0 : i32
    %c0_i32_1 = arith.constant 0 : i32
    return %c0_i32, %c0_i32_0 : i32, i32
  }
  func.func @transform_6(%arg0: i32) -> (i32, i32) {
    %c0_i32 = arith.constant 0 : i32
    %c0_i32_0 = arith.constant 0 : i32
    %c0_i32_1 = arith.constant 0 : i32
    return %c0_i32, %c0_i32_0 : i32, i32
  }
  func.func @transform_7(%arg0: i32) -> (i32, i32) {
    %c0_i32 = arith.constant 0 : i32
    %c0_i32_0 = arith.constant 0 : i32
    %c0_i32_1 = arith.constant 0 : i32
    return %c0_i32, %c0_i32_0 : i32, i32
  }
  func.func @transform_8(%arg0: i32) -> (i32, i32) {
    %c0_i32 = arith.constant 0 : i32
    %c0_i32_0 = arith.constant 0 : i32
    %c0_i32_1 = arith.constant 0 : i32
    return %c0_i32, %c0_i32_0 : i32, i32
  }
  func.func @transform_9(%arg0: i32) -> (i32, i32) {
    %c0_i32 = arith.constant 0 : i32
    %c0_i32_0 = arith.constant 0 : i32
    return %c0_i32, %arg0 : i32, i32
  }
}

</mosaic_0001>

<bundles_post_ra>
// kernel: tpu_custom_call.1
= control target key start
LH: loop header
LB: loop body
LE: loop exit
PB: predicated region body
PF: predicated region fallthrough
CT: control target
= control target key end

     0   :  { %v570_v3 = vmov 0   ;;  %vm84_vm0 = vcmask 130048   ;;  %s840_s0 = inlined_call_operand.vmem [shape: f32[16,128], index: 0, kind: input, shape index: {}]   ;;  %s841_s1 = inlined_call_operand.vmem [shape: f32[50,128], index: 1, kind: input, shape index: {}]   ;;  %s842_s2 = inlined_call_operand.vmem [shape: f32[20,128], index: 2, kind: input, shape index: {}]   ;;  %s843_s3 = inlined_call_operand.vmem [shape: f32[50,16], index: 3, kind: input, shape index: {}]   ;;  %s844_s4 = inlined_call_operand.vmem [shape: f32[50,1], index: 4, kind: input, shape index: {}]   ;;  %s845_s5 = inlined_call_operand.vmem [shape: f32[20,50], index: 5, kind: input, shape index: {}]   ;;  %s846_s6 = inlined_call_operand.vmem [shape: f32[20,1], index: 6, kind: input, shape index: {}]   ;;  %s847_s7 = inlined_call_operand.vmem [shape: f32[2,20], index: 7, kind: input, shape index: {}]   ;;  %s848_s8 = inlined_call_operand.vmem [shape: f32[2,1], index: 8, kind: input, shape index: {}]   ;;  %s849_s9 = inlined_call_operand.hbm [shape: f32[2,128], index: 9, kind: output, shape index: {}]  }
   0x1   :  { %v34_v0 = vld [vmem:[%s840_s0 + $0x8] sm:$0xff]  ;;  %v48_v1 = vld [vmem:[%s844_s4 + $0x30] sm:$0x3]  ;;  %v33_v2 = vld [vmem:[%s840_s0] sm:$0xff]  ;;  %497 = vset.pattern.permute.xlu0 %v570_v3  ;;  %498 = vset.pattern.permute.xlu1 %v570_v3 }
   0x2   :  { %120 = vmatpush.msra.mxu0 %v34_v0  ;;  %v35_v4 = vld [vmem:[%s843_s3] sm:$0xff]  ;;  %493 = vmatpush.msra.mxu3 %v34_v0  ;;  %v44_v7 = vld [vmem:[%s844_s4 + $0x10] sm:$0xff] }
   0x3   :  { %81 = vperm.xlu0 %497, %v48_v1   ;;  %v39_v5 = vld [vmem:[%s843_s3 + $0x20] sm:$0xff]  ;;  %499 = vset.pattern.permute.xlu2 %v570_v3 }
   0x4   :  { %v46_v6 = vld [vmem:[%s844_s4 + $0x20] sm:$0xff]  ;;  %121 = vmatpush.msra.mxu0 %v33_v2  ;;  %494 = vmatpush.msra.mxu3 %v33_v2 }
   0x5   :  { %480 = vmatmul.msk.f32.vlgmr.msra.gmra.mxu0 %vm84_vm0, %v35_v4  ;;  %484 = vmatmul.msk.f32.vlgmr.msra.gmra.mxu3 %vm84_vm0, %v39_v5 }
   0x6   :  { %71 = vperm.xlu1 %498, %v46_v6  }
   0x7   :  { %14 = vsyncpa [#allocation3], 0  ;;  %v47_v8 = vld [vmem:[%s844_s4 + $0x28] sm:$0xff]  ;;  %61 = vperm.xlu2 %499, %v44_v7   ;;  %v45_v11 = vld [vmem:[%s844_s4 + $0x18] sm:$0xff]  ;;  %vm315_vm3 = vcmask 1041408  }
   0x8   :  { %v36_v9 = vld [vmem:[%s843_s3 + $0x8] sm:$0xff]  ;;  %v42_v13 = vld [vmem:[%s844_s4] sm:$0xff]  ;;  %v37_v14 = vld [vmem:[%s843_s3 + $0x10] sm:$0xff] }
   0x9   :  { %v40_v10 = vld [vmem:[%s843_s3 + $0x28] sm:$0xff]  ;;  %v41_v15 = vld [vmem:[%s843_s3 + $0x30] sm:$0x3]  ;;  %v287_v18 = vld [vmem:[%s846_s6] sm:$0xff] }
   0xa   :  { %v43_v12 = vld [vmem:[%s844_s4 + $0x8] sm:$0xff]  ;;  %v289_v16 = vld [vmem:[%s846_s6 + $0x10] sm:$0xf]  ;;  %v38_v19 = vld [vmem:[%s843_s3 + $0x18] sm:$0xff] }
   0xb   :  { %76 = vperm.xlu0 %497, %v47_v8   ;;  %v288_v17 = vld [vmem:[%s846_s6 + $0x8] sm:$0xff]  ;;  %v406_v20 = vld [vmem:[%s848_s8] sm:$0x3]  ;;  %s471_s8 = sshll.u32 %s849_s9, 4  ;;  %s472_s8 = int_to_ptr.hbm [resolvable:$true] %s471_s8 }
   0xd   :  { %481 = vmatmul.msk.f32.gmra.mxu0 %vm84_vm0, %v36_v9  ;;  %485 = vmatmul.msk.f32.gmra.mxu3 %vm84_vm0, %v40_v10 }
   0xe   :  { %66 = vperm.xlu1 %498, %v45_v11  }
   0xf   :  { %56 = vperm.xlu2 %499, %v43_v12  }
  0x13   :  { %51 = vperm.xlu0 %497, %v42_v13  }
  0x15   :  { %482 = vmatmul.msk.f32.gmra.mxu0 %vm84_vm0, %v37_v14  ;;  %486 = vmatmul.msk.f32.gmra.mxu3 %vm84_vm0, %v41_v15 }
  0x16   :  { %302 = vperm.xlu1 %498, %v289_v16  }
  0x17   :  { %297 = vperm.xlu2 %499, %v288_v17  }
  0x1b   :  { %292 = vperm.xlu0 %497, %v287_v18  }
  0x1d   :  { %483 = vmatmul.msk.f32.gmra.mxu0 %vm84_vm0, %v38_v19  ;;  %vm305_vm0 = vcmask 408576  }
  0x1e   :  { %409 = vperm.xlu1 %498, %v406_v20  }
  0x61   :  { %v62_v22 = vpop.permute.xlu2 %61 }
  0x69   :  { %v57_v28 = vpop.permute.xlu2 %56 }
  0x75   :  { %v82_v21 = vpop.permute.xlu0 %81 }
  0x78   :  { %v72_v25 = vpop.permute.xlu1 %71 }
  0x7d   :  { %v77_v23 = vpop.permute.xlu0 %76 }
  0x80   :  { %v67_v52 = vpop.permute.xlu1 %66 }
  0x82   :  { %v123_v24 = vpop.f32.mrf.mxu0 }
  0x85   :  { %v52_v30 = vpop.permute.xlu0 %51 }
  0x86   :  { %v694_v33 = vadd.f32 %v123_v24, %v52_v30 }
  0x88   :  { %v135_v26 = vpop.f32.mrf.mxu3  ;;  %v165_v39 = vand.u32 2147483647, %v694_v33  ;;  %vm151_vm15 = vcmp.ne.f32.partialorder %v694_v33, %v694_v33 }
  0x89   :  { %v689_v27 = vadd.f32 %v135_v26, %v72_v25 }
  0x8a   :  { %v126_v29 = vpop.f32.mrf.mxu0  ;;  %v172_v46 = vsub.f32 0.0, %v165_v39 }
  0x8b   :  { %v169_v31 = vand.u32 2147483647, %v689_v27  ;;  %v692_v32 = vadd.f32 %v126_v29, %v57_v28  ;;  %v148_v10 = vmax.f32 %v689_v27, 0.0  ;;  %vm155_vm10 = vcmp.ne.f32.partialorder %v689_v27, %v689_v27 }
  0x8c   :  { %v179_v55 = vmul.f32 1.442695, %v172_v46 }
  0x8d   :  { %v176_v34 = vsub.f32 0.0, %v169_v31  ;;  %v166_v35 = vand.u32 2147483647, %v692_v32  ;;  %vm152_vm14 = vcmp.ne.f32.partialorder %v692_v32, %v692_v32 }
  0x8f   :  { %v187_v41 = vmul.f32 1.442695, %v176_v34  ;;  %v173_v43 = vsub.f32 0.0, %v166_v35 }
  0x90   :  { %v138_v36 = vpop.f32.mrf.mxu3 }
  0x91   :  { %v697_v37 = vadd.f32 %v138_v36, %v77_v23  ;;  %500 = vpow2.f32 %v187_v41  ;;  %v181_v49 = vmul.f32 1.442695, %v173_v43 }
  0x92   :  { %v129_v38 = vpop.f32.mrf.mxu0 }
  0x93   :  { %v700_v40 = vadd.f32 %v129_v38, %v62_v22  ;;  %v170_v42 = vand.u32 2147483647, %v697_v37  ;;  %v149_v11 = vmax.f32 %v697_v37, 0.0  ;;  %vm156_vm1 = vcmp.ne.f32.partialorder %v697_v37, %v697_v37 }
  0x95   :  { %v167_v44 = vand.u32 2147483647, %v700_v40  ;;  %v177_v45 = vsub.f32 0.0, %v170_v42  ;;  %v146_v23 = vmax.f32 %v700_v40, 0.0  ;;  %vm153_vm13 = vcmp.ne.f32.partialorder %v700_v40, %v700_v40 }
  0x97   :  { %v174_v47 = vsub.f32 0.0, %v167_v44  ;;  %v189_v48 = vmul.f32 1.442695, %v177_v45  ;;  %v501_v59 = vpop.eup %500  ;;  %v285_v44 = vld [vmem:[%s845_s5 + $0x8] sm:$0xff] }
  0x98   :  { %v141_v51 = vpop.f32.mrf.mxu3  ;;  %v229_v2 = vadd.f32 1.0, %v501_v59  ;;  %v232_v12 = vmul.f32 -0.5, %v501_v59  ;;  %v235_v16 = vand.u32 2147483647, %v501_v59 }
  0x99   :  { %v183_v50 = vmul.f32 1.442695, %v174_v47  ;;  %502 = vpow2.f32 %v189_v48  ;;  %v704_v53 = vadd.f32 %v141_v51, %v82_v21 }
  0x9a   :  { %v132_v54 = vpop.f32.mrf.mxu0  ;;  %v233_v28 = vadd.f32 1.0, %v232_v12  ;;  %vm728_vm2 = vcmp.lt.f32.partialorder %v235_v16, 0.0004427343 }
  0x9b   :  { %v706_v56 = vadd.f32 %v132_v54, %v67_v52  ;;  %504 = vpow2.f32 %v183_v50  ;;  %v171_v57 = vand.u32 2147483647, %v704_v53  ;;  %v150_v42 = vmax.f32 %v704_v53, 0.0 }
  0x9c   :  { %506 = vpow2.f32 %v181_v49  ;;  %v234_v48 = vmul.f32 %v501_v59, %v233_v28  ;;  %vm157_vm8 = vcmp.ne.f32.partialorder %v704_v53, %v704_v53 }
  0x9d   :  { %v168_v58 = vand.u32 2147483647, %v706_v56  ;;  %v178_v60 = vsub.f32 0.0, %v171_v57  ;;  %508 = vpow2.f32 %v179_v55  ;;  %v147_v52 = vmax.f32 %v706_v56, 0.0 }
  0x9e   :  { %vm154_vm12 = vcmp.ne.f32.partialorder %v706_v56, %v706_v56 }
  0x9f   :  { %v175_v61 = vsub.f32 0.0, %v168_v58  ;;  %v503_v62 = vpop.eup %502  ;;  %v191_v63 = vmul.f32 1.442695, %v178_v60 }
  0xa0   :  { %v238_v1 = vadd.f32 1.0, %v503_v62  ;;  %v241_v7 = vmul.f32 -0.5, %v503_v62  ;;  %v244_v24 = vand.u32 2147483647, %v503_v62 }
  0xa1   :  { %v185_v0 = vmul.f32 1.442695, %v175_v61  ;;  %v710_v3 = vpop.eup %504  ;;  %510 = vpow2.f32 %v191_v63 }
  0xa2   :  { %v712_v4 = vpop.eup %506  ;;  %v211_v6 = vadd.f32 1.0, %v710_v3  ;;  %v242_v20 = vadd.f32 1.0, %v241_v7  ;;  %v214_v29 = vmul.f32 -0.5, %v710_v3  ;;  %vm733_vm4 = vcmp.lt.f32.partialorder %v244_v24, 0.0004427343  ;;  %v274_v24 = vld [vmem:[%s841_s1 + $0x20] sm:$0xff] }
  0xa3   :  { %512 = vpow2.f32 %v185_v0  ;;  %v714_v5 = vpop.eup %508  ;;  %v202_v8 = vadd.f32 1.0, %v712_v4  ;;  %v205_v30 = vmul.f32 -0.5, %v712_v4  ;;  %v217_v54 = vand.u32 2147483647, %v710_v3 }
  0xa4   :  { %514 = vlog2.f32 %v238_v1  ;;  %v193_v13 = vadd.f32 1.0, %v714_v5  ;;  %v196_v17 = vmul.f32 -0.5, %v714_v5  ;;  %v199_v34 = vand.u32 2147483647, %v714_v5 }
  0xa5   :  { %516 = vlog2.f32 %v229_v2  ;;  %v243_v36 = vmul.f32 %v503_v62, %v242_v20  ;;  %v215_v50 = vadd.f32 1.0, %v214_v29  ;;  %v206_v55 = vadd.f32 1.0, %v205_v30 }
  0xa6   :  { %518 = vlog2.f32 %v211_v6  ;;  %v197_v31 = vadd.f32 1.0, %v196_v17  ;;  %v208_v57 = vand.u32 2147483647, %v712_v4  ;;  %vm750_vm7 = vcmp.lt.f32.partialorder %v217_v54, 0.0004427343 }
  0xa7   :  { %v511_v9 = vpop.eup %510  ;;  %520 = vlog2.f32 %v202_v8  ;;  %v216_v7 = vmul.f32 %v710_v3, %v215_v50  ;;  %vm200_vm11 = vcmp.lt.f32.partialorder %v199_v34, 0.0004427343  ;;  %v272_v34 = vld [vmem:[%s841_s1 + $0x10] sm:$0xff]  ;;  %v298_v50 = vpop.permute.xlu2 %297 }
  0xa8   :  { %v247_v15 = vadd.f32 1.0, %v511_v9  ;;  %v250_v19 = vmul.f32 -0.5, %v511_v9  ;;  %v253_v43 = vand.u32 2147483647, %v511_v9  ;;  %vm767_vm9 = vcmp.lt.f32.partialorder %v208_v57, 0.0004427343 }
  0xa9   :  { %v513_v14 = vpop.eup %512 }
  0xaa   :  { %v515_v18 = vpop.eup %514  ;;  %v220_v21 = vadd.f32 1.0, %v513_v14  ;;  %522 = vlog2.f32 %v247_v15  ;;  %v223_v25 = vmul.f32 -0.5, %v513_v14  ;;  %v251_v35 = vadd.f32 1.0, %v250_v19 }
  0xab   :  { %v517_v22 = vpop.eup %516  ;;  %v240_v26 = vmul.f32 0.6931472, %v515_v18  ;;  %v226_v49 = vand.u32 2147483647, %v513_v14  ;;  %vm254_vm5 = vcmp.lt.f32.partialorder %v253_v43, 0.0004427343 }
  0xac   :  { %524 = vlog2.f32 %v220_v21  ;;  %v231_v38 = vmul.f32 0.6931472, %v517_v22  ;;  %v519_v41 = vpop.eup %518  ;;  %v224_v45 = vadd.f32 1.0, %v223_v25  ;;  %v252_v61 = vmul.f32 %v511_v9, %v251_v35  ;;  %v275_v18 = vld [vmem:[%s841_s1 + $0x28] sm:$0xff] }
  0xad   :  { %526 = vlog2.f32 %v193_v13  ;;  %v521_v46 = vpop.eup %520  ;;  %v246_v47 = vsel %vm733_vm4, %v243_v36, %v240_v26  ;;  %v213_v63 = vmul.f32 0.6931472, %v519_v41  ;;  %vm227_vm6 = vcmp.lt.f32.partialorder %v226_v49, 0.0004427343  ;;  %v276_v13 = vld [vmem:[%s841_s1 + $0x30] sm:$0x3] }
  0xae   :  { %v237_v62 = vsel %vm728_vm2, %v234_v48, %v231_v38  ;;  %v261_v59 = vadd.f32 %v246_v47, %v149_v11  ;;  %v225_v2 = vmul.f32 %v513_v14, %v224_v45  ;;  %v204_v8 = vmul.f32 0.6931472, %v521_v46  ;;  %v271_v38 = vld [vmem:[%s841_s1 + $0x8] sm:$0xff]  ;;  %v270_v41 = vld [vmem:[%s841_s1] sm:$0xff]  ;;  %v293_v45 = vpop.permute.xlu0 %292 }
  0xaf   :  { %v260_v9 = vadd.f32 %v237_v62, %v148_v10  ;;  %v219_v3 = vsel %vm750_vm7, %v216_v7, %v213_v63  ;;  %v207_v11 = vmul.f32 %v712_v4, %v206_v55  ;;  %v198_v4 = vmul.f32 %v714_v5, %v197_v31 }
  0xb0   :  { %v523_v51 = vpop.eup %522  ;;  %v268_v10 = vsel %vm156_vm1, %v697_v37, %v261_v59  ;;  %v145_v37 = vmax.f32 %v692_v32, 0.0  ;;  %v258_v25 = vadd.f32 %v219_v3, %v146_v23  ;;  %v144_v5 = vmax.f32 %v694_v33, 0.0 }
  0xb1   :  { %v249_v60 = vmul.f32 0.6931472, %v523_v51  ;;  %v267_v22 = vsel %vm155_vm10, %v689_v27, %v260_v9  ;;  %v282_v26 = vmul.f32 %v275_v18, %v268_v10  ;;  %v273_v27 = vld [vmem:[%s841_s1 + $0x18] sm:$0xff] }
  0xb2   :  { %v525_v58 = vpop.eup %524  ;;  %v281_v31 = vmul.f32 %v274_v24, %v267_v22  ;;  %v265_v23 = vsel %vm153_vm13, %v700_v40, %v258_v25 }
  0xb3   :  { %v527_v0 = vpop.eup %526  ;;  %v222_v1 = vmul.f32 0.6931472, %v525_v58  ;;  %v255_v6 = vsel %vm254_vm5, %v252_v61, %v249_v60  ;;  %v279_v39 = vmul.f32 %v272_v34, %v265_v23  ;;  %v303_v60 = vpop.permute.xlu1 %302  ;;  %v401_v23 = vld [vmem:[%s842_s2 + $0x10] sm:$0xf] }
  0xb4   :  { %v262_v12 = vadd.f32 %v255_v6, %v150_v42  ;;  %v195_v14 = vmul.f32 0.6931472, %v527_v0 }
  0xb5   :  { %v228_v15 = vsel %vm227_vm6, %v225_v2, %v222_v1  ;;  %vm416_vm6 = vcmask 1043456  }
  0xb6   :  { %v269_v17 = vsel %vm157_vm8, %v704_v53, %v262_v12  ;;  %v259_v19 = vadd.f32 %v228_v15, %v147_v52  ;;  %v210_v53 = vsel %vm767_vm9, %v207_v11, %v204_v8  ;;  %v201_v28 = vsel %vm200_vm11, %v198_v4, %v195_v14 }
  0xb7   :  { %v283_v21 = vmul.f32 %v276_v13, %v269_v17  ;;  %v257_v30 = vadd.f32 %v210_v53, %v145_v37  ;;  %v256_v35 = vadd.f32 %v201_v28, %v144_v5  ;;  %vm412_vm8 = vcmask 162816  }
  0xb8   :  { %v266_v29 = vsel %vm154_vm12, %v706_v56, %v259_v19 }
  0xb9   :  { %487 = vmatpush.msk.msra.mxu1 %vm315_vm3, %v283_v21  ;;  %v280_v36 = vmul.f32 %v273_v27, %v266_v29  ;;  %v264_v56 = vsel %vm152_vm14, %v692_v32, %v257_v30  ;;  %v263_v40 = vsel %vm151_vm15, %v694_v33, %v256_v35  ;;  %v284_v32 = vld [vmem:[%s845_s5] sm:$0xff]  ;;  %v286_v33 = vld [vmem:[%s845_s5 + $0x10] sm:$0xf] }
  0xba   :  { %v278_v42 = vmul.f32 %v271_v38, %v264_v56  ;;  %v277_v43 = vmul.f32 %v270_v41, %v263_v40  ;;  %v400_v56 = vld [vmem:[%s842_s2 + $0x8] sm:$0xff]  ;;  %v399_v40 = vld [vmem:[%s842_s2] sm:$0xff]  ;;  %s571_s2 = smov [#allocation2]  }
  0xbb   :  { %329 = vmatpush.msra.mxu1 %v282_v26 }
  0xbd   :  { %330 = vmatpush.msra.mxu1 %v281_v31 }
  0xbf   :  { %331 = vmatpush.msra.mxu1 %v280_v36 }
  0xc1   :  { %332 = vmatpush.msra.mxu1 %v279_v39 }
  0xc3   :  { %333 = vmatpush.msra.mxu1 %v278_v42 }
  0xc5   :  { %334 = vmatpush.msra.mxu1 %v277_v43  ;;  %v405_v43 = vld [vmem:[%s847_s7] sm:$0x3]  ;;  %s469_s7 = sshll.u32 %s571_s2, 4  ;;  %s470_s7 = int_to_ptr.vmem [resolvable:$true] %s469_s7 }
  0xc6   :  { %488 = vmatmul.msk.f32.vlgmr.msra.gmra.mxu1 %vm305_vm0, %v284_v32  ;;  %v410_v32 = vpop.permute.xlu1 %409 }
  0xce   :  { %489 = vmatmul.msk.f32.gmra.mxu1 %vm305_vm0, %v285_v44 }
  0xd6   :  { %490 = vmatmul.msk.f32.gmra.mxu1 %vm305_vm0, %v286_v33 }
 0x143   :  { %v336_v46 = vpop.f32.mrf.mxu1 }
 0x144   :  { %v818_v47 = vadd.f32 %v336_v46, %v293_v45 }
 0x146   :  { %v354_v48 = vand.u32 2147483647, %v818_v47  ;;  %v345_v5 = vmax.f32 %v818_v47, 0.0  ;;  %vm348_vm7 = vcmp.ne.f32.partialorder %v818_v47, %v818_v47 }
 0x148   :  { %v357_v49 = vsub.f32 0.0, %v354_v48 }
 0x14a   :  { %v360_v54 = vmul.f32 1.442695, %v357_v49 }
 0x14b   :  { %v339_v51 = vpop.f32.mrf.mxu1 }
 0x14c   :  { %v340_v52 = vadd.f32 %v339_v51, %v298_v50  ;;  %528 = vpow2.f32 %v360_v54 }
 0x14e   :  { %v355_v55 = vand.u32 2147483647, %v340_v52  ;;  %v346_v24 = vmax.f32 %v340_v52, 0.0  ;;  %vm349_vm5 = vcmp.ne.f32.partialorder %v340_v52, %v340_v52 }
 0x150   :  { %v358_v57 = vsub.f32 0.0, %v355_v55 }
 0x152   :  { %v362_v58 = vmul.f32 1.442695, %v358_v57  ;;  %v529_v0 = vpop.eup %528 }
 0x153   :  { %v342_v61 = vpop.f32.mrf.mxu1  ;;  %v366_v7 = vadd.f32 1.0, %v529_v0  ;;  %v369_v13 = vmul.f32 -0.5, %v529_v0  ;;  %v372_v18 = vand.u32 2147483647, %v529_v0 }
 0x154   :  { %530 = vpow2.f32 %v362_v58  ;;  %v343_v62 = vadd.f32 %v342_v61, %v303_v60 }
 0x155   :  { %v370_v10 = vadd.f32 1.0, %v369_v13  ;;  %vm373_vm2 = vcmp.lt.f32.partialorder %v372_v18, 0.0004427343 }
 0x156   :  { %v356_v63 = vand.u32 2147483647, %v343_v62  ;;  %v347_v29 = vmax.f32 %v343_v62, 0.0  ;;  %vm350_vm4 = vcmp.ne.f32.partialorder %v343_v62, %v343_v62 }
 0x157   :  { %v371_v37 = vmul.f32 %v529_v0, %v370_v10 }
 0x158   :  { %v359_v59 = vsub.f32 0.0, %v356_v63 }
 0x15a   :  { %v531_v1 = vpop.eup %530  ;;  %v364_v2 = vmul.f32 1.442695, %v359_v59 }
 0x15b   :  { %v375_v6 = vadd.f32 1.0, %v531_v1  ;;  %v378_v8 = vmul.f32 -0.5, %v531_v1  ;;  %v381_v14 = vand.u32 2147483647, %v531_v1 }
 0x15c   :  { %532 = vpow2.f32 %v364_v2 }
 0x15d   :  { %534 = vlog2.f32 %v375_v6  ;;  %v379_v3 = vadd.f32 1.0, %v378_v8  ;;  %vm382_vm1 = vcmp.lt.f32.partialorder %v381_v14, 0.0004427343 }
 0x15e   :  { %536 = vlog2.f32 %v366_v7 }
 0x15f   :  { %v380_v20 = vmul.f32 %v531_v1, %v379_v3 }
 0x162   :  { %v533_v12 = vpop.eup %532 }
 0x163   :  { %v535_v9 = vpop.eup %534  ;;  %v384_v15 = vadd.f32 1.0, %v533_v12  ;;  %v387_v16 = vmul.f32 -0.5, %v533_v12  ;;  %v390_v53 = vand.u32 2147483647, %v533_v12 }
 0x164   :  { %v537_v11 = vpop.eup %536  ;;  %v377_v17 = vmul.f32 0.6931472, %v535_v9 }
 0x165   :  { %538 = vlog2.f32 %v384_v15  ;;  %v388_v19 = vadd.f32 1.0, %v387_v16  ;;  %v368_v21 = vmul.f32 0.6931472, %v537_v11  ;;  %vm391_vm3 = vcmp.lt.f32.partialorder %v390_v53, 0.0004427343 }
 0x166   :  { %v383_v4 = vsel %vm382_vm1, %v380_v20, %v377_v17 }
 0x167   :  { %v389_v26 = vmul.f32 %v533_v12, %v388_v19  ;;  %v374_v28 = vsel %vm373_vm2, %v371_v37, %v368_v21  ;;  %v394_v27 = vadd.f32 %v383_v4, %v346_v24 }
 0x168   :  { %v393_v34 = vadd.f32 %v374_v28, %v345_v5 }
 0x169   :  { %v397_v36 = vsel %vm349_vm5, %v340_v52, %v394_v27  ;;  %v440_v52 = vlaneseq }
 0x16a   :  { %v396_v39 = vsel %vm348_vm7, %v818_v47, %v393_v34  ;;  %v403_v41 = vmul.f32 %v400_v56, %v397_v36 }
 0x16b   :  { %v539_v22 = vpop.eup %538  ;;  %v402_v42 = vmul.f32 %v399_v40, %v396_v39  ;;  %v441_v61 = vshrl.u32 %v440_v52, 7 }
 0x16c   :  { %v386_v25 = vmul.f32 0.6931472, %v539_v22 }
 0x16d   :  { %vm442_vm11 = vcmp.eq.s32.totalorder %v441_v61, 0 }
 0x16e   :  { %v392_v30 = vsel %vm391_vm3, %v389_v26, %v386_v25 }
 0x16f   :  { %v395_v31 = vadd.f32 %v392_v30, %v347_v29 }
 0x171   :  { %v398_v35 = vsel %vm350_vm4, %v343_v62, %v395_v31 }
 0x172   :  { %v404_v38 = vmul.f32 %v401_v23, %v398_v35 }
 0x174   :  { %491 = vmatpush.msk.msra.mxu2 %vm416_vm6, %v404_v38 }
 0x176   :  { %434 = vmatpush.msra.mxu2 %v403_v41 }
 0x178   :  { %435 = vmatpush.msra.mxu2 %v402_v42 }
 0x179   :  { %492 = vmatmul.msk.f32.vlgmr.msra.gmra.mxu2 %vm412_vm8, %v405_v43 }
 0x1fc   :  { %v437_v44 = vpop.f32.mrf.mxu2 }
 0x1fd   :  { %v438_v33 = vadd.f32 %v437_v44, %v410_v32 }
 0x1ff   :  { %v446_v45 = vand.u32 2147483647, %v438_v33  ;;  %v443_v60 = vmax.f32 %v438_v33, 0.0  ;;  %vm444_vm10 = vcmp.ne.f32.partialorder %v438_v33, %v438_v33 }
 0x201   :  { %v447_v46 = vsub.f32 0.0, %v446_v45 }
 0x203   :  { %v448_v47 = vmul.f32 1.442695, %v447_v46 }
 0x205   :  { %540 = vpow2.f32 %v448_v47 }
 0x20b   :  { %v541_v48 = vpop.eup %540 }
 0x20c   :  { %v450_v49 = vadd.f32 1.0, %v541_v48  ;;  %v453_v50 = vmul.f32 -0.5, %v541_v48  ;;  %v456_v54 = vand.u32 2147483647, %v541_v48 }
 0x20e   :  { %542 = vlog2.f32 %v450_v49  ;;  %v454_v51 = vadd.f32 1.0, %v453_v50  ;;  %vm457_vm9 = vcmp.lt.f32.partialorder %v456_v54, 0.0004427343 }
 0x210   :  { %v455_v58 = vmul.f32 %v541_v48, %v454_v51 }
 0x214   :  { %v543_v55 = vpop.eup %542 }
 0x215   :  { %v452_v57 = vmul.f32 0.6931472, %v543_v55 }
 0x217   :  { %v458_v62 = vsel %vm457_vm9, %v455_v58, %v452_v57 }
 0x218   :  { %v459_v63 = vadd.f32 %v458_v62, %v443_v60 }
 0x21a   :  { %v460_v0 = vsel %vm444_vm10, %v438_v33, %v459_v63 }
 0x21b   :  { %v461_v59 = vadd.f32 1e-06, %v460_v0 }
 0x21d   :  { %v462_v1 = vsel %vm442_vm11, %v438_v33, %v461_v59 }
 0x21e   :  { %463 = vst [vmem:[#allocation2] sm:$0x3] %v462_v1 }
 0x21f   :  { %474 = dma.vmem_to_hbm [thread:$0]  %s470_s7, 32, %s472_s8, [#allocation3]  }
 0x220   :  { %568 = dma.done.wait [#allocation3], 32  }
 0x221   :  { %569 = vsyncadd [#allocation3], 4294967264 }
 0x222   :  { %479 = vsyncpa [#allocation3], 1 }

</bundles_post_ra>
